<compile_context>
chip_gen: v7x
topology: tpu7x:2x2x1
jax: 0.10.0
libtpu: 0.0.40
codegen_flags: <defaults>
</compile_context>

<pallas_src>
import functools

import jax
import jax.numpy as jnp
from jax.experimental import pallas as pl
from jax.experimental.pallas import tpu as pltpu

THRESHOLD = 1.0
LEAK = 0.5

# Lane-dense layout targets: wide 128-multiple lane dim, ~2 MiB f32 blocks.
_LANE_WIDTHS = (1024, 512, 256, 128)
_TARGET_BLOCK_ROWS = 512   # (512, 1024) f32 = 2 MiB per array per block
_MIN_BLOCK_ROWS = 64       # never accept blocks smaller than 64 rows
_VMEM_LIMIT_BYTES = 32 * 1024 * 1024  # 4 streams x 2 buffers x 2 MiB = 16 MiB + headroom


def _spiking_kernel(x_ref, mem_ref, spike_ref, mem_out_ref, *, leak, threshold):
    # LIF update: mem = leak*mem + x ; spike where mem >= thr ; reset spiked mem.
    mem = leak * mem_ref[...] + x_ref[...]
    spiked = mem >= threshold
    spike_ref[...] = jnp.where(spiked, jnp.float32(1.0), jnp.float32(0.0))
    mem_out_ref[...] = jnp.where(spiked, jnp.float32(0.0), mem)


def _choose_layout(n):
    """Pick (W, rows, block_rows) for an n-element f32 tensor.

    Prefers a wide (lane-dense) slab and ~2 MiB blocks; pads only when n
    doesn't already fit the chosen tiling, and never lets the block collapse
    below _MIN_BLOCK_ROWS rows (per-step DMA overhead would dominate).
    """
    W = None
    for w in _LANE_WIDTHS:
        if n % w == 0:
            W = w
            break
    if W is None:
        W = 128
    rows = -(-n // W)  # cdiv

    if rows <= _TARGET_BLOCK_ROWS:
        # Small slab: split into 2 blocks when rows allows (multiple-of-8
        # halves) so v7x's two TensorCores both participate; else one block.
        if rows >= 16 and rows % 16 == 0:
            block_rows = rows // 2
        else:
            block_rows = rows
    else:
        block_rows = None
        for br in range(_TARGET_BLOCK_ROWS, _MIN_BLOCK_ROWS - 1, -8):
            if rows % br == 0:
                block_rows = br
                break
        if block_rows is None:
            # No reasonable divisor: pad rows up instead of tiny blocks.
            block_rows = _TARGET_BLOCK_ROWS
            rows = -(-rows // block_rows) * block_rows
    return W, rows, block_rows


def _to_slab(a, W, rows, n):
    flat = a.reshape(-1)
    padded_n = rows * W
    if padded_n != n:
        # TODO(synk): ragged tail still pays a pad/slice HBM pass; a persistent
        # padded membrane slab (or prefix+tail split) would remove it.
        flat = jnp.pad(flat, (0, padded_n - n))
    return flat.reshape(rows, W)


@functools.partial(
    jax.jit,
    static_argnames=("threshold", "leak"),
    donate_argnames=("mem_potential",),
)
def _forward_impl(x, mem_potential, *, threshold, leak):
    orig_shape = x.shape
    n = x.size
    W, rows, block_rows = _choose_layout(n)

    x2d = _to_slab(x, W, rows, n)
    m2d = _to_slab(mem_potential, W, rows, n)
    grid = (rows // block_rows,)

    kernel = functools.partial(_spiking_kernel, leak=leak, threshold=threshold)
    block = pl.BlockSpec((block_rows, W), lambda i: (i, 0))

    total = rows * W
    spike2d, mem2d = pl.pallas_call(
        kernel,
        out_shape=(
            jax.ShapeDtypeStruct((rows, W), jnp.float32),
            jax.ShapeDtypeStruct((rows, W), jnp.float32),
        ),
        grid_spec=pltpu.PrefetchScalarGridSpec(
            num_scalar_prefetch=0,
            grid=grid,
            in_specs=[block, block],
            out_specs=[block, block],
        ),
        # Recurrent membrane state updated in place (mem_potential is donated,
        # so this is a genuine alias rather than a defensive copy).
        input_output_aliases={1: 1},
        cost_estimate=pl.CostEstimate(
            flops=3 * total, transcendentals=0, bytes_accessed=16 * total
        ),
        compiler_params=pltpu.CompilerParams(
            dimension_semantics=("parallel",),
            vmem_limit_bytes=_VMEM_LIMIT_BYTES,
        ),
    )(x2d, m2d)

    if rows * W != n:  # only slice the padded tail off when padding was added
        spike = spike2d.reshape(-1)[:n].reshape(orig_shape)
        new_mem = mem2d.reshape(-1)[:n].reshape(orig_shape)
    else:
        spike = spike2d.reshape(orig_shape)
        new_mem = mem2d.reshape(orig_shape)
    return spike, new_mem


def spiking_neuron_forward(x, mem_potential=None, *, threshold=THRESHOLD, leak=LEAK):
    """Functional equivalent of SpikingNeuron.forward.

    Returns (spike, new_mem_potential), both with the same shape as x, f32.
    NOTE: mem_potential is donated (in-place membrane update); do not reuse
    the passed-in membrane array after this call.
    """
    x = x.astype(jnp.float32)
    if mem_potential is None:
        mem_potential = jnp.zeros_like(x)
    else:
        mem_potential = mem_potential.astype(jnp.float32)
    return _forward_impl(x, mem_potential, threshold=float(threshold), leak=float(leak))


def _reference_forward(x, mem, threshold=THRESHOLD, leak=LEAK):
    x = x.astype(jnp.float32)
    if mem is None:
        mem = jnp.zeros_like(x)
    mem = leak * mem + x
    spike = (mem >= threshold).astype(jnp.float32)
    mem = mem * (1.0 - spike)
    return spike, mem


if __name__ == "__main__":
    key = jax.random.PRNGKey(0)

    # --- NCHW input, like the PyTorch module would see from a conv stack. ---
    x_shape = (2, 4, 16, 16)
    k1, k2, k3, k4 = jax.random.split(key, 4)
    x1 = jax.random.normal(k1, x_shape, dtype=jnp.float32) * 1.5
    x2 = jax.random.normal(k2, x_shape, dtype=jnp.float32) * 1.5

    spike1, mem1 = spiking_neuron_forward(x1, None)
    jax.block_until_ready((spike1, mem1))
    ref_spike1, ref_mem1 = _reference_forward(x1, None)
    assert jnp.allclose(spike1, ref_spike1)
    assert jnp.allclose(mem1, ref_mem1, atol=1e-6)
    assert spike1.shape == x_shape and spike1.dtype == jnp.float32

    # Second timestep: recurrent membrane state flows back in (and is donated).
    spike2, mem2 = spiking_neuron_forward(x2, mem1)
    jax.block_until_ready((spike2, mem2))
    ref_spike2, ref_mem2 = _reference_forward(x2, ref_mem1)
    assert jnp.allclose(spike2, ref_spike2)
    assert jnp.allclose(mem2, ref_mem2, atol=1e-6)

    # --- larger shape: exercises the multi-block (grid >= 2) path. ---
    xb = jax.random.normal(k3, (8, 64, 32, 32), dtype=jnp.float32) * 1.5
    sb, mb = spiking_neuron_forward(xb, None)
    jax.block_until_ready((sb, mb))
    rsb, rmb = _reference_forward(xb, None)
    assert jnp.allclose(sb, rsb) and jnp.allclose(mb, rmb, atol=1e-6)

    # --- awkward shape: exercises the pad/slice fallback path. ---
    xo = jax.random.normal(k4, (3, 5, 7, 11), dtype=jnp.float32) * 1.5
    so, mo = spiking_neuron_forward(xo, None)
    jax.block_until_ready((so, mo))
    rso, rmo = _reference_forward(xo, None)
    assert jnp.allclose(so, rso) and jnp.allclose(mo, rmo, atol=1e-6)

    print("KERNEL_OK")
</pallas_src>

<mosaic_0001>
module attributes {stable_mosaic.version = 11 : i64} {
  func.func @_spiking_kernel(%arg0: i32, %arg1: memref<2x1024xf32, #tpu.memory_space<vmem>>, %arg2: memref<2x1024xf32, #tpu.memory_space<vmem>>, %arg3: memref<2x1024xf32, #tpu.memory_space<vmem>>, %arg4: memref<2x1024xf32, #tpu.memory_space<vmem>>) attributes {dimension_semantics = [#tpu.dimension_semantics<parallel>], iteration_bounds = array<i64: 1>, scalar_prefetch = 0 : i64, scratch_operands = 0 : i64, tpu.core_type = #tpu.core_type<tc>, window_params = [{transform_indices = @transform_0, window_bounds = array<i64: 2, 1024>}, {transform_indices = @transform_1, window_bounds = array<i64: 2, 1024>}, {transform_indices = @transform_2, window_bounds = array<i64: 2, 1024>}, {transform_indices = @transform_3, window_bounds = array<i64: 2, 1024>}]} {
    %c0 = arith.constant 0 : index
    %c0_0 = arith.constant 0 : index
    %0 = vector.load %arg2[%c0, %c0_0] : memref<2x1024xf32, #tpu.memory_space<vmem>>, vector<2x1024xf32>
    %cst = arith.constant 5.000000e-01 : f32
    %1 = vector.broadcast %cst : f32 to vector<2x1024xf32>
    %2 = arith.mulf %1, %0 : vector<2x1024xf32>
    %c0_1 = arith.constant 0 : index
    %c0_2 = arith.constant 0 : index
    %3 = vector.load %arg1[%c0_1, %c0_2] : memref<2x1024xf32, #tpu.memory_space<vmem>>, vector<2x1024xf32>
    %4 = arith.addf %2, %3 : vector<2x1024xf32>
    %cst_3 = arith.constant 1.000000e+00 : f32
    %5 = vector.broadcast %cst_3 : f32 to vector<2x1024xf32>
    %6 = arith.cmpf oge, %4, %5 : vector<2x1024xf32>
    %cst_4 = arith.constant 1.000000e+00 : f32
    %cst_5 = arith.constant 0.000000e+00 : f32
    %7 = vector.broadcast %cst_4 : f32 to vector<2x1024xf32>
    %8 = vector.broadcast %cst_5 : f32 to vector<2x1024xf32>
    %9 = arith.select %6, %7, %8 : vector<2x1024xi1>, vector<2x1024xf32>
    %c0_6 = arith.constant 0 : index
    %c0_7 = arith.constant 0 : index
    %10 = vector.load %arg3[%c0_6, %c0_7] : memref<2x1024xf32, #tpu.memory_space<vmem>>, vector<2x1024xf32>
    tpu.vector_store %arg3[%c0_6, %c0_7], %9 {strides = array<i32>} : memref<2x1024xf32, #tpu.memory_space<vmem>>, vector<2x1024xf32>,
    %cst_8 = arith.constant 0.000000e+00 : f32
    %11 = vector.broadcast %cst_8 : f32 to vector<2x1024xf32>
    %12 = arith.select %6, %11, %4 : vector<2x1024xi1>, vector<2x1024xf32>
    %c0_9 = arith.constant 0 : index
    %c0_10 = arith.constant 0 : index
    %13 = vector.load %arg4[%c0_9, %c0_10] : memref<2x1024xf32, #tpu.memory_space<vmem>>, vector<2x1024xf32>
    tpu.vector_store %arg4[%c0_9, %c0_10], %12 {strides = array<i32>} : memref<2x1024xf32, #tpu.memory_space<vmem>>, vector<2x1024xf32>,
    return
  }
  func.func @transform_0(%arg0: i32) -> (i32, i32) {
    %c0_i32 = arith.constant 0 : i32
    %c0_i32_0 = arith.constant 0 : i32
    return %arg0, %c0_i32 : i32, i32
  }
  func.func @transform_1(%arg0: i32) -> (i32, i32) {
    %c0_i32 = arith.constant 0 : i32
    %c0_i32_0 = arith.constant 0 : i32
    return %arg0, %c0_i32 : i32, i32
  }
  func.func @transform_2(%arg0: i32) -> (i32, i32) {
    %c0_i32 = arith.constant 0 : i32
    %c0_i32_0 = arith.constant 0 : i32
    return %arg0, %c0_i32 : i32, i32
  }
  func.func @transform_3(%arg0: i32) -> (i32, i32) {
    %c0_i32 = arith.constant 0 : i32
    %c0_i32_0 = arith.constant 0 : i32
    return %arg0, %c0_i32 : i32, i32
  }
}

</mosaic_0001>

<bundles_post_ra>
// kernel: _forward_impl.1
= control target key start
LH: loop header
LB: loop body
LE: loop exit
PB: predicated region body
PF: predicated region fallthrough
CT: control target
= control target key end

     0   :  { %v40_v8 = vmov 0.0   ;;  %s85_s0 = inlined_call_operand.vmem [shape: f32[2,1024], index: 0, kind: input, shape index: {}]   ;;  %s86_s1 = inlined_call_operand.vmem [shape: f32[2,1024], index: 1, kind: input, shape index: {}, may-alias: {1,3}]   ;;  %s87_s2 = inlined_call_operand.vmem [shape: f32[2,1024], index: 2, kind: output, shape index: {0}]   ;;  %s88_s3 = inlined_call_operand.vmem [shape: f32[2,1024], index: 3, kind: output, shape index: {1}, may-alias: {1,3}]  }
   0x1   :  { %v13_v0 = vld [vmem:[%s86_s1] sm:$0xff]  ;;  %v14_v2 = vld [vmem:[%s86_s1 + $0x8] sm:$0xff] }
   0x2   :  { %v17_v1 = vld [vmem:[%s85_s0] sm:$0xff]  ;;  %v15_v3 = vmul.f32 0.5, %v13_v0  ;;  %v16_v4 = vmul.f32 0.5, %v14_v2  ;;  %v18_v5 = vld [vmem:[%s85_s0 + $0x8] sm:$0xff] }
   0x4   :  { %v19_v6 = vadd.f32 %v17_v1, %v15_v3  ;;  %v20_v7 = vadd.f32 %v18_v5, %v16_v4 }
   0x6   :  { %vm21_vm0 = vcmp.ge.f32.partialorder %v19_v6, 1.0  ;;  %vm22_vm1 = vcmp.ge.f32.partialorder %v20_v7, 1.0 }
   0x7   :  { %v23_v9 = vsel %vm21_vm0, 1.0, %v40_v8  ;;  %v24_v10 = vsel %vm22_vm1, 1.0, %v40_v8  ;;  %v27_v11 = vsel %vm21_vm0, 0.0, %v19_v6  ;;  %v28_v12 = vsel %vm22_vm1, 0.0, %v20_v7 }
   0x8   :  { %25 = vst [vmem:[%s87_s2] sm:$0xff] %v23_v9  ;;  %26 = vst [vmem:[%s87_s2 + $0x8] sm:$0xff] %v24_v10 }
   0x9   :  { %29 = vst [vmem:[%s88_s3] sm:$0xff] %v27_v11  ;;  %30 = vst [vmem:[%s88_s3 + $0x8] sm:$0xff] %v28_v12 }

</bundles_post_ra>
